<compile_context>
chip_gen: v6e
topology: v6e:2x2x1
jax: 0.10.0
libtpu: 0.0.40
codegen_flags: <defaults>
</compile_context>

<pallas_src>
import functools

import jax
import jax.numpy as jnp
from jax.experimental import pallas as pl
from jax.experimental.pallas import tpu as pltpu

K_NEIGHBORS = 3          # module hyperparam; forward math only ever uses k=1
NUM_SAMPLES = 100
EPSILON = 1e-8

MAX_TILE_N = 512         # query points per grid step (lanes)
MAX_TILE_M = 4096        # reference points per chunk (sublanes of the dot tile)
_SENTINEL = 1e30         # folded b_sq value for padded reference rows -> never the min


def _round_up(x: int, mult: int) -> int:
    return ((x + mult - 1) // mult) * mult


def _min_dist_kernel(at_ref, asq_ref, b_ref, out_ref, acc_ref):
    """Column-wise running min over reference chunks of (b_sq - 2 a.b).

    Per grid step (i = query tile, k = reference chunk):
      at_ref  : (8, TILE_N)   query points, xyz on sublanes 0..2, sublane 3 = 1
      asq_ref : (1, TILE_N)   per-query squared norm
      b_ref   : (TILE_M, 8)   reference chunk, lanes 0..2 = -2*b, lane 3 = |b|^2
                              (sentinel on pad rows), lanes 4..7 = 0
      out_ref : (1, TILE_N)   lane-dense min distance per query
      acc_ref : (1, TILE_N)   running column-min accumulator (tiny VMEM scratch)
    """
    k = pl.program_id(1)

    # MXU: (TILE_M, 8) @ (8, TILE_N) -> (TILE_M, TILE_N) = |b|^2 - 2 a.b
    # (the -2 scale and the b_sq term ride in the otherwise-zero padded lanes,
    #  so there is no per-vreg VPU scale/add and no separate b_sq stream).
    part = jnp.dot(b_ref[...], at_ref[...], preferred_element_type=jnp.float32)

    # Reduce along the reference axis right away (VPU tree + one XLU reduce),
    # then fold into a (1, TILE_N) accumulator -> no bulk VMEM acc traffic.
    col_min = jnp.min(part, axis=0, keepdims=True)            # (1, TILE_N)

    @pl.when(k == 0)
    def _init():
        acc_ref[...] = col_min

    @pl.when(k != 0)
    def _accum():
        acc_ref[...] = jnp.minimum(acc_ref[...], col_min)

    @pl.when(k == pl.num_programs(1) - 1)
    def _finalize():
        # one add + one sqrt per query (EUP), lane-dense single-row store
        d2 = jnp.maximum(acc_ref[...] + asq_ref[...], 0.0)     # clamp cancellation
        out_ref[...] = jnp.sqrt(d2)


def min_euclidean_distances(a: jnp.ndarray, b: jnp.ndarray) -> jnp.ndarray:
    """a: (N, 3), b: (M, 3) -> (N,) min_j ||a_i - b_j||_2, computed in Pallas."""
    a = a.astype(jnp.float32)
    b = b.astype(jnp.float32)
    n, m = a.shape[0], b.shape[0]

    # --- query-axis tiling: lane-aligned, and >=2 tiles when possible so the
    #     "parallel" i axis can shard across v7x's two TensorCores -------------
    n_pad128 = _round_up(max(n, 1), 128)
    tile_n = min(MAX_TILE_N, n_pad128)
    if n_pad128 // tile_n < 2 and n_pad128 > 128:
        tile_n = _round_up((n_pad128 + 1) // 2, 128)
    n_pad = _round_up(n_pad128, tile_n)

    # --- reference-axis tiling ----------------------------------------------
    m8 = _round_up(max(m, 1), 8)
    tile_m = min(MAX_TILE_M, m8)
    m_pad = _round_up(m8, tile_m)

    n_tiles = n_pad // tile_n
    m_tiles = m_pad // tile_m

    # Pre-transposed / pre-folded operands (built once, outside the grid loop).
    a_t = jnp.zeros((8, n_pad), jnp.float32)
    a_t = a_t.at[:3, :n].set(a.T)
    a_t = a_t.at[3, :].set(1.0)                                  # picks up b_sq
    a_sq = jnp.zeros((1, n_pad), jnp.float32).at[0, :n].set(jnp.sum(a * a, axis=1))

    b_p = jnp.zeros((m_pad, 8), jnp.float32)
    b_p = b_p.at[:m, :3].set(-2.0 * b)                           # fold the -2 scale
    b_p = b_p.at[:, 3].set(_SENTINEL)                            # pad rows: huge
    b_p = b_p.at[:m, 3].set(jnp.sum(b * b, axis=1))              # real rows: |b|^2

    # b stream is re-read once per query tile; account for it honestly.
    cost = pl.CostEstimate(
        flops=int(n_pad) * int(m_pad) * (2 * 8 + 2),
        transcendentals=int(n_pad),
        bytes_accessed=4 * (9 * int(n_pad)                        # a_t + a_sq
                            + int(n_pad)                          # output row
                            + int(n_tiles) * int(m_pad) * 8),     # b re-reads
    )

    out = pl.pallas_call(
        _min_dist_kernel,
        out_shape=jax.ShapeDtypeStruct((1, n_pad), jnp.float32),
        grid_spec=pltpu.PrefetchScalarGridSpec(
            num_scalar_prefetch=0,
            grid=(n_tiles, m_tiles),
            in_specs=[
                pl.BlockSpec((8, tile_n), lambda i, k: (0, i)),   # a_t (resident per i)
                pl.BlockSpec((1, tile_n), lambda i, k: (0, i)),   # a_sq
                pl.BlockSpec((tile_m, 8), lambda i, k: (k, 0)),   # folded b chunk
            ],
            out_specs=pl.BlockSpec((1, tile_n), lambda i, k: (0, i)),
            scratch_shapes=[pltpu.VMEM((1, tile_n), jnp.float32)],
        ),
        compiler_params=pltpu.CompilerParams(
            dimension_semantics=("parallel", "arbitrary"),
            # dot intermediate (tile_m x tile_n f32 = 8 MiB) + double-buffered
            # inputs; well under every generation's physical VMEM (v7x 64 MiB).
            vmem_limit_bytes=24 * 1024 * 1024,
        ),
        cost_estimate=cost,
    )(a_t, a_sq, b_p)
    return out[0, :n]


def _compute_barycenters(vertices: jnp.ndarray, faces: jnp.ndarray) -> jnp.ndarray:
    # vertices[faces].mean(dim=1) -> (F, 3); tiny gather, stays in JAX glue.
    return jnp.mean(vertices[faces], axis=1)


def probabilistic_surface_distance_loss(
    original_vertices: jnp.ndarray,      # (Vo, 3) f32
    original_faces: jnp.ndarray,         # (Fo, 3) i32
    simplified_vertices: jnp.ndarray,    # (Vs, 3) f32
    simplified_faces: jnp.ndarray,       # (Fs, 3) i32
    face_probabilities: jnp.ndarray,     # (P,)   f32
    *,
    num_samples: int = NUM_SAMPLES,
    epsilon: float = EPSILON,
    rng_key=None,
) -> jnp.ndarray:
    if original_vertices.shape[0] == 0 or simplified_vertices.shape[0] == 0:
        return jnp.array(0.0, jnp.float32)

    fs = simplified_faces.shape[0]
    if fs == 0:
        return jnp.array(0.0, jnp.float32)

    # pad / truncate face_probabilities to Fs (torch.nn.functional.pad semantics)
    p = face_probabilities.astype(jnp.float32)
    pad_amt = max(0, fs - p.shape[0])
    p = jnp.pad(p, (0, pad_amt))[:fs]

    # ---------------- forward term ----------------
    simp_bary = _compute_barycenters(simplified_vertices.astype(jnp.float32),
                                     simplified_faces)
    orig_bary = _compute_barycenters(original_vertices.astype(jnp.float32),
                                     original_faces)
    # cdist(simp_bary, orig_bary, p=2).min(dim=1)  -> Pallas kernel
    min_distances = min_euclidean_distances(simp_bary, orig_bary)     # (Fs,)
    forward_term = jnp.sum(p * min_distances) + 1e-4 * jnp.sum(1.0 - p)

    # ---------------- reverse term ----------------
    if rng_key is None:
        rng_key = jax.random.PRNGKey(0)
    k1, k2 = jax.random.split(rng_key)

    face_vertices = simplified_vertices.astype(jnp.float32)[simplified_faces]  # (Fs,3,3)
    sqrt_r1 = jnp.sqrt(jax.random.uniform(k1, (fs, num_samples, 1), jnp.float32))
    r2 = jax.random.uniform(k2, (fs, num_samples, 1), jnp.float32)
    a = 1.0 - sqrt_r1
    b = sqrt_r1 * (1.0 - r2)
    c = sqrt_r1 * r2
    samples = (a * face_vertices[:, None, 0]
               + b * face_vertices[:, None, 1]
               + c * face_vertices[:, None, 2]).reshape(-1, 3)        # (Fs*S, 3)

    # kNN(k=1) distances from sampled points to original vertices -> Pallas kernel
    dists = min_euclidean_distances(samples, original_vertices)       # (Fs*S,)
    max_dist = jnp.max(dists) + epsilon
    scaled = dists / max_dist * 0.1
    probs_expanded = jnp.repeat(p, num_samples)
    reverse_term = jnp.sum(probs_expanded * scaled)

    # torch.equal(original, simplified) early-exit: only possible when shapes match
    if (original_vertices.shape == simplified_vertices.shape
            and original_faces.shape == simplified_faces.shape):
        same = jnp.logical_and(
            jnp.all(original_vertices == simplified_vertices),
            jnp.all(original_faces == simplified_faces))
        reverse_term = jnp.where(same, 0.0, reverse_term)

    return forward_term + reverse_term


if __name__ == "__main__":
    key = jax.random.PRNGKey(0)
    k_ov, k_sv, k_of, k_sf, k_p, k_sample = jax.random.split(key, 6)

    # small deterministic mesh-like inputs
    n_orig_v, n_orig_f = 32, 20
    n_simp_v, n_simp_f = 16, 10

    original_vertices = jax.random.normal(k_ov, (n_orig_v, 3), jnp.float32)
    simplified_vertices = jax.random.normal(k_sv, (n_simp_v, 3), jnp.float32)
    original_faces = jax.random.randint(k_of, (n_orig_f, 3), 0, n_orig_v, jnp.int32)
    simplified_faces = jax.random.randint(k_sf, (n_simp_f, 3), 0, n_simp_v, jnp.int32)
    # shorter than n_simp_f to exercise the padding path
    face_probabilities = jax.random.uniform(k_p, (8,), jnp.float32)

    loss_fn = functools.partial(probabilistic_surface_distance_loss,
                                rng_key=k_sample)
    loss = loss_fn(original_vertices, original_faces,
                   simplified_vertices, simplified_faces,
                   face_probabilities)
    jax.block_until_ready(loss)
    assert loss.shape == () and jnp.isfinite(loss)
    print("KERNEL_OK")
</pallas_src>

<mosaic_0001>
module attributes {stable_mosaic.version = 11 : i64} {
  func.func @_min_dist_kernel(%arg0: i32, %arg1: i32, %arg2: memref<8x128xf32, #tpu.memory_space<vmem>>, %arg3: memref<1x128xf32, #tpu.memory_space<vmem>>, %arg4: memref<24x8xf32, #tpu.memory_space<vmem>>, %arg5: memref<1x128xf32, #tpu.memory_space<vmem>>, %arg6: memref<1x128xf32, #tpu.memory_space<vmem>>) attributes {dimension_semantics = [#tpu.dimension_semantics<parallel>, #tpu.dimension_semantics<arbitrary>], iteration_bounds = array<i64: 1, 1>, scalar_prefetch = 0 : i64, scratch_operands = 1 : i64, tpu.core_type = #tpu.core_type<tc>, window_params = [{transform_indices = @transform_0, window_bounds = array<i64: 8, 128>}, {transform_indices = @transform_1, window_bounds = array<i64: 1, 128>}, {transform_indices = @transform_2, window_bounds = array<i64: 24, 8>}, {transform_indices = @transform_3, window_bounds = array<i64: 1, 128>}]} {
    %c0 = arith.constant 0 : index
    %c0_0 = arith.constant 0 : index
    %0 = vector.load %arg4[%c0, %c0_0] : memref<24x8xf32, #tpu.memory_space<vmem>>, vector<24x8xf32>
    %c0_1 = arith.constant 0 : index
    %c0_2 = arith.constant 0 : index
    %1 = vector.load %arg2[%c0_1, %c0_2] : memref<8x128xf32, #tpu.memory_space<vmem>>, vector<8x128xf32>
    %cst = arith.constant dense<0.000000e+00> : vector<24x128xf32>
    %2 = tpu.matmul %0, %1, %cst {dimension_numbers = #tpu.dot_dimension_numbers<[1], [0], [0], [1], [0, 0, 1, 1], [], []>} : vector<24x8xf32>, vector<8x128xf32>, vector<24x128xf32> -> vector<24x128xf32>
    %cst_3 = arith.constant dense<0x7F800000> : vector<128xf32>
    %3 = vector.multi_reduction <minimumf>, %2, %cst_3 [0] : vector<24x128xf32> to vector<128xf32>
    %4 = vector.shape_cast %3 : vector<128xf32> to vector<1x128xf32>
    %c0_i32 = arith.constant 0 : i32
    %5 = arith.cmpi eq, %arg1, %c0_i32 : i32
    %6 = arith.extui %5 : i1 to i32
    %c0_i32_4 = arith.constant 0 : i32
    %7 = arith.cmpi ne, %6, %c0_i32_4 : i32
    scf.if %7 {
      %c0_9 = arith.constant 0 : index
      %c0_10 = arith.constant 0 : index
      %14 = vector.load %arg6[%c0_9, %c0_10] : memref<1x128xf32, #tpu.memory_space<vmem>>, vector<1x128xf32>
      tpu.vector_store %arg6[%c0_9, %c0_10], %4 {strides = array<i32>} : memref<1x128xf32, #tpu.memory_space<vmem>>, vector<1x128xf32>,
    } else {
    }
    %c0_i32_5 = arith.constant 0 : i32
    %8 = arith.cmpi ne, %arg1, %c0_i32_5 : i32
    %9 = arith.extui %8 : i1 to i32
    %c0_i32_6 = arith.constant 0 : i32
    %10 = arith.cmpi ne, %9, %c0_i32_6 : i32
    scf.if %10 {
      %c0_9 = arith.constant 0 : index
      %c0_10 = arith.constant 0 : index
      %14 = vector.load %arg6[%c0_9, %c0_10] : memref<1x128xf32, #tpu.memory_space<vmem>>, vector<1x128xf32>
      %15 = arith.minimumf %14, %4 : vector<1x128xf32>
      %c0_11 = arith.constant 0 : index
      %c0_12 = arith.constant 0 : index
      %16 = vector.load %arg6[%c0_11, %c0_12] : memref<1x128xf32, #tpu.memory_space<vmem>>, vector<1x128xf32>
      tpu.vector_store %arg6[%c0_11, %c0_12], %15 {strides = array<i32>} : memref<1x128xf32, #tpu.memory_space<vmem>>, vector<1x128xf32>,
    } else {
    }
    %c0_i32_7 = arith.constant 0 : i32
    %11 = arith.cmpi eq, %arg1, %c0_i32_7 : i32
    %12 = arith.extui %11 : i1 to i32
    %c0_i32_8 = arith.constant 0 : i32
    %13 = arith.cmpi ne, %12, %c0_i32_8 : i32
    scf.if %13 {
      %c0_9 = arith.constant 0 : index
      %c0_10 = arith.constant 0 : index
      %14 = vector.load %arg6[%c0_9, %c0_10] : memref<1x128xf32, #tpu.memory_space<vmem>>, vector<1x128xf32>
      %c0_11 = arith.constant 0 : index
      %c0_12 = arith.constant 0 : index
      %15 = vector.load %arg3[%c0_11, %c0_12] : memref<1x128xf32, #tpu.memory_space<vmem>>, vector<1x128xf32>
      %16 = arith.addf %14, %15 : vector<1x128xf32>
      %cst_13 = arith.constant 0.000000e+00 : f32
      %17 = vector.broadcast %cst_13 : f32 to vector<1x128xf32>
      %18 = arith.maximumf %16, %17 : vector<1x128xf32>
      %19 = math.sqrt %18 : vector<1x128xf32>
      %c0_14 = arith.constant 0 : index
      %c0_15 = arith.constant 0 : index
      %20 = vector.load %arg5[%c0_14, %c0_15] : memref<1x128xf32, #tpu.memory_space<vmem>>, vector<1x128xf32>
      tpu.vector_store %arg5[%c0_14, %c0_15], %19 {strides = array<i32>} : memref<1x128xf32, #tpu.memory_space<vmem>>, vector<1x128xf32>,
    } else {
    }
    return
  }
  func.func @transform_0(%arg0: i32, %arg1: i32) -> (i32, i32) {
    %c0_i32 = arith.constant 0 : i32
    %c0_i32_0 = arith.constant 0 : i32
    return %c0_i32, %arg0 : i32, i32
  }
  func.func @transform_1(%arg0: i32, %arg1: i32) -> (i32, i32) {
    %c0_i32 = arith.constant 0 : i32
    %c0_i32_0 = arith.constant 0 : i32
    return %c0_i32, %arg0 : i32, i32
  }
  func.func @transform_2(%arg0: i32, %arg1: i32) -> (i32, i32) {
    %c0_i32 = arith.constant 0 : i32
    %c0_i32_0 = arith.constant 0 : i32
    return %arg1, %c0_i32 : i32, i32
  }
  func.func @transform_3(%arg0: i32, %arg1: i32) -> (i32, i32) {
    %c0_i32 = arith.constant 0 : i32
    %c0_i32_0 = arith.constant 0 : i32
    return %c0_i32, %arg0 : i32, i32
  }
}

</mosaic_0001>

<bundles_post_ra>
// kernel: tpu_custom_call.1
= control target key start
LH: loop header
LB: loop body
LE: loop exit
PB: predicated region body
PF: predicated region fallthrough
CT: control target
= control target key end

     0   :  { %v205_v1 = vmov 0.0   ;;  %vm19_vm0 = vcmask 64512   ;;  %s246_s0 = inlined_call_operand.vmem [shape: f32[8,128], index: 0, kind: input, shape index: {}]   ;;  %s247_s1 = inlined_call_operand.vmem [shape: f32[1,128], index: 1, kind: input, shape index: {}]   ;;  %s248_s2 = inlined_call_operand.vmem [shape: f32[24,8], index: 2, kind: input, shape index: {}]   ;;  %s249_s3 = inlined_call_operand.hbm [shape: f32[1,128], index: 3, kind: output, shape index: {}]  }
   0x1   :  { %v18_v0 = vld [vmem:[%s246_s0] sm:$0xff]  ;;  %165 = vmatprep.subr.mxu0 %v205_v1  ;;  %176 = vmatprep.subr.mxu1 %v205_v1  ;;  %v16_v3 = vld [vmem:[%s248_s2 + $0x8] sm:$0xff] }
   0x2   :  { %v15_v2 = vld [vmem:[%s248_s2] sm:$0xff] }
   0x3   :  { %8 = vsyncpa [#allocation4], 0  ;;  %166 = vmatpush3.msra.mxu0 %v18_v0  ;;  %177 = vmatpush3.msra.mxu1 %v18_v0  ;;  %vm206_vm1 = vmmov 0   ;;  %v17_v4 = vld [vmem:[%s248_s2 + $0x10] sm:$0xff]  ;;  %v133_v19 = vld [vmem:[%s247_s1] sm:$0x1] }
   0x4   :  { %167 = vmatprep.mubr.msk.f32.mxu0 %vm206_vm1, %v205_v1  ;;  %170 = vmatprep.mubr.msk.f32.mxu1 %vm206_vm1, %v205_v1  ;;  %s207_s2 = smov [#allocation3]  }
   0x5   :  { %168 = vmatmul.mubr.msk.f32.vlgmr.msra.gmra.mxu0 %vm19_vm0, %v15_v2  ;;  %171 = vmatmul.mubr.msk.f32.vlgmr.msra.gmra.mxu1 %vm19_vm0, %v16_v3  ;;  %s150_s21 = sshll.u32 %s207_s2, 4  ;;  %s151_s21 = int_to_ptr.vmem [resolvable:$true] %s150_s21 }
   0x6   :  { %173 = vmatprep.mubr.msk.f32.mxu1 %vm206_vm1, %v205_v1  ;;  %s183_s22 = scalar_lea.vmem %s151_s21, 16  ;;  %s187_s23 = scalar_lea.vmem %s151_s21, 32 }
   0x7   :  { %p184_p0 = scmp.ne.s32.totalorder %s151_s21, %s183_s22  ;;  %p188_p1 = scmp.lt.s32.totalorder %s151_s21, %s151_s21 }
   0x8   :  { %p189_p2 = scmp.lt.s32.totalorder %s187_s23, %s183_s22 }
   0x9   :  { %174 = vmatmul.mubr.msk.f32.gmra.mxu1 %vm19_vm0, %v17_v4 }
   0xa   :  { %p190_p3 = por %p189_p2, %p188_p1 }
   0xc   :  { %p191_p4 = pnand %p190_p3, %p184_p0 }
  0xc5   :  { %v95_v5 = vpop.f32.mrf.mxu0  ;;  %v100_v6 = vpop.f32.mrf.mxu1 }
  0xc6   :  { %v109_v9 = vmin.f32 %v95_v5, %v100_v6 }
  0xc7   :  { %v169_v7 = vpop.f32.mrf.mxu0  ;;  %v172_v8 = vpop.f32.mrf.mxu1 }
  0xc9   :  { %v105_v10 = vpop.f32.mrf.mxu1 }
  0xca   :  { %v110_v11 = vmin.f32 %v109_v9, %v105_v10 }
  0xcb   :  { %v175_v12 = vpop.f32.mrf.mxu1 }
  0xcc   :  { %v111_v13 = vrot.slane %v110_v11, 4 }
  0xce   :  { %v112_v14 = vmin.f32 %v110_v11, %v111_v13 }
  0xd0   :  { %v113_v15 = vrot.slane %v112_v14, 2 }
  0xd2   :  { %v114_v16 = vmin.f32 %v112_v14, %v113_v15 }
  0xd4   :  { %v115_v17 = vrot.slane %v114_v16, 1 }
  0xd6   :  { %v116_v18 = vmin.f32 %v114_v16, %v115_v17 }
  0xd8   :  { %121 = vst [vmem:[#allocation2] sm:$0x1] %v116_v18 }
  0xdf   :  { %v132_v20 = vld [vmem:[#allocation2] sm:$0x1] }
  0xe0   :  { %v134_v21 = vadd.f32 %v133_v19, %v132_v20 }
  0xe2   :  { %v135_v22 = vmax.f32 %v134_v21, 0.0 }
  0xe4   :  { %181 = vrsqrt.f32 %v135_v22  ;;  %vm138_vm2 = vcmp.eq.f32.partialorder %v135_v22, inf  ;;  %v141_v25 = vand.u32 2147483648, %v135_v22  ;;  %vm140_vm3 = vcmp.eq.f32.partialorder %v135_v22, 0.0 }
  0xf1   :  { %v182_v23 = vpop.eup %181 }
  0xf2   :  { %v137_v24 = vmul.f32 %v182_v23, %v135_v22 }
  0xf4   :  { %v139_v26 = vsel %vm138_vm2, %v135_v22, %v137_v24 }
  0xf5   :  { %v142_v27 = vsel %vm140_vm3, %v141_v25, %v139_v26 }
  0xf6   :  { %143 = vst [vmem:[#allocation3] sm:$0x1] %v142_v27 }
  0xf7   :  { %194 = shalt.err (!%p191_p4)
}
  0xf8   :  { %153 = dma.vmem_to_hbm [thread:$0]  %s151_s21, 16, %s249_s3, [#allocation4]  }
  0xf9   :  { %203 = dma.done.wait [#allocation4], 16  }
  0xfa   :  { %204 = vsyncadd [#allocation4], 4294967280 }
  0xfb   :  { %157 = vsyncpa [#allocation4], 1 }

</bundles_post_ra>
